<compile_context>
chip_gen: v5e
topology: v5e:2x2
jax: 0.10.0
libtpu: 0.0.40
codegen_flags: <defaults>
</compile_context>

<pallas_src>
import functools

import jax
import jax.numpy as jnp
from jax.experimental import pallas as pl
from jax.experimental.pallas import tpu as pltpu

SELU_ALPHA = 1.6732632423543772848170429916717
SELU_SCALE = 1.0507009873554804934193349852946
BN_EPS = 1e-5

TB_MAX = 4096                 # batch-tile cap (fits v7x 64 MiB VMEM with margin)
VMEM_LIMIT_BYTES = 48 << 20   # scoped-VMEM cap; < v7x physical, << v5e/v6e


def _cdiv(a, b):
    return -(-a // b)


def _round_up(n, m):
    return _cdiv(n, m) * m


def _selu_unscaled(x):
    # f(x) = x                      for x > 0
    #        alpha * (exp(x) - 1)   for x <= 0
    # SELU(x) = SCALE * f(x); SCALE is folded into the next layer's weights.
    # Clamp the exp argument so the discarded positive branch never overflows.
    neg = SELU_ALPHA * (jnp.exp(jnp.minimum(x, 0.0)) - 1.0)
    return jnp.where(x > 0, x, neg)


def _selu_full(x):
    return SELU_SCALE * _selu_unscaled(x)


# ---------------------------------------------------------------------------
# Kernel: x -> (x@W1'+b1') f -> (.@W2'+b2') f -> (.@W3'+b3') f -> .@W4'+b4
# BN folding and SELU_SCALE already baked into W'/b'.  MXU in bf16, acc f32.
# ---------------------------------------------------------------------------
def mlp_kernel(x_ref,
               w1_ref, b1_ref,
               w2_ref, b2_ref,
               w3_ref, b3_ref,
               w4_ref, b4_ref,
               o_ref):
    x = x_ref[...].astype(jnp.bfloat16)

    h = jnp.dot(x, w1_ref[...], preferred_element_type=jnp.float32) + b1_ref[...]
    h = _selu_unscaled(h)
    # TODO(synk): nn.Dropout(0.3) is identity in eval mode; no RNG masking here.

    h = jnp.dot(h.astype(jnp.bfloat16), w2_ref[...],
                preferred_element_type=jnp.float32) + b2_ref[...]
    h = _selu_unscaled(h)

    h = jnp.dot(h.astype(jnp.bfloat16), w3_ref[...],
                preferred_element_type=jnp.float32) + b3_ref[...]
    h = _selu_unscaled(h)

    o_ref[...] = (jnp.dot(h.astype(jnp.bfloat16), w4_ref[...],
                          preferred_element_type=jnp.float32)
                  + b4_ref[...]).astype(o_ref.dtype)


# ---------------------------------------------------------------------------
# One-time parameter preprocessing (NOT in the per-call jitted path).
# Folds BN scale/shift + linear bias + SELU_SCALE into weights/biases,
# pre-transposes to (in, out), casts dot operands to bf16.  No output padding.
# ---------------------------------------------------------------------------
def prepare_params(params, eps=BN_EPS):
    def fold(w, b, g, be, rm, rv, in_scale=1.0):
        scale = g / jnp.sqrt(rv + eps)                              # (out,)
        shift = be - rm * scale                                     # (out,)
        w_f = (in_scale * w.T * scale[None, :]).astype(jnp.bfloat16)  # (in, out)
        b_f = (b * scale + shift).reshape(1, -1).astype(jnp.float32)
        return w_f, b_f

    w1, b1 = fold(params["w1"], params["b1"],
                  params["g1"], params["be1"], params["rm1"], params["rv1"])
    # SELU_SCALE of the previous layer's activation folded into these weights.
    w2, b2 = fold(params["w2"], params["b2"],
                  params["g2"], params["be2"], params["rm2"], params["rv2"],
                  in_scale=SELU_SCALE)
    w3, b3 = fold(params["w3"], params["b3"],
                  params["g3"], params["be3"], params["rm3"], params["rv3"],
                  in_scale=SELU_SCALE)
    w4 = (SELU_SCALE * params["w4"].T).astype(jnp.bfloat16)          # (128, out)
    b4 = params["b4"].reshape(1, -1).astype(jnp.float32)

    return dict(w1=w1, b1=b1, w2=w2, b2=b2, w3=w3, b3=b3, w4=w4, b4=b4)


# ---------------------------------------------------------------------------
# Forward wrapper: balanced batch-tiled grid, weights VMEM-resident.
# ---------------------------------------------------------------------------
@jax.jit
def mlp_forward(x, prep):
    B, d_in = x.shape
    out_dim = prep["w4"].shape[1]

    # Balanced tiling: choose tile count first (avoids up-to-a-full-tile
    # padding), keep tb sublane-aligned, and guarantee >=2 grid steps for
    # B >= 16 so v7x's second TensorCore gets work.
    n_tiles = max(1, _cdiv(B, TB_MAX))
    if B >= 16:
        n_tiles = max(n_tiles, 2)
    tb = _round_up(_cdiv(B, n_tiles), 8)
    b_pad = _round_up(B, tb)
    if b_pad != B:
        x = jnp.pad(x, ((0, b_pad - B), (0, 0)))
    grid = (b_pad // tb,)

    def resident(arr):
        # Constant block index -> DMA'd once, stays in VMEM across batch tiles.
        return pl.BlockSpec(arr.shape, lambda i: (0, 0))

    in_specs = [
        pl.BlockSpec((tb, d_in), lambda i: (i, 0)),      # x: tiled over batch
        resident(prep["w1"]), resident(prep["b1"]),
        resident(prep["w2"]), resident(prep["b2"]),
        resident(prep["w3"]), resident(prep["b3"]),
        resident(prep["w4"]), resident(prep["b4"]),
    ]
    # Unpadded, lane-masked output block: last dim equals the full array dim,
    # so the (8,128) rule is satisfied and HBM writes are 16 B/row, not 512 B.
    out_specs = pl.BlockSpec((tb, out_dim), lambda i: (i, 0))

    weight_bytes = sum(int(v.size) * v.dtype.itemsize for v in prep.values())
    cost = pl.CostEstimate(
        flops=2 * b_pad * (d_in * 128 + 128 * 256 + 256 * 128 + 128 * out_dim),
        transcendentals=b_pad * (128 + 256 + 128),
        bytes_accessed=(b_pad * d_in * x.dtype.itemsize
                        + b_pad * out_dim * 4
                        + weight_bytes),
    )

    out = pl.pallas_call(
        mlp_kernel,
        out_shape=jax.ShapeDtypeStruct((b_pad, out_dim), jnp.float32),
        grid=grid,
        in_specs=in_specs,
        out_specs=out_specs,
        compiler_params=pltpu.CompilerParams(
            dimension_semantics=("parallel",),
            vmem_limit_bytes=VMEM_LIMIT_BYTES),
        cost_estimate=cost,
    )(x,
      prep["w1"], prep["b1"],
      prep["w2"], prep["b2"],
      prep["w3"], prep["b3"],
      prep["w4"], prep["b4"])

    return out[:B]


# ---------------------------------------------------------------------------
# Synthetic parameters + references
# ---------------------------------------------------------------------------
def init_params(key, input_dim, output_dim):
    """Deterministic synthetic parameters with the shapes nn.Module implies."""
    ks = jax.random.split(key, 16)

    def linear(kw, kb, fan_in, fan_out):
        bound = 1.0 / jnp.sqrt(fan_in)
        w = jax.random.uniform(kw, (fan_out, fan_in), jnp.float32, -bound, bound)
        b = jax.random.uniform(kb, (fan_out,), jnp.float32, -bound, bound)
        return w, b

    w1, b1 = linear(ks[0], ks[1], input_dim, 128)
    w2, b2 = linear(ks[2], ks[3], 128, 256)
    w3, b3 = linear(ks[4], ks[5], 256, 128)
    w4, b4 = linear(ks[6], ks[7], 128, output_dim)

    def bn(kg, kb, n):
        gamma = 1.0 + 0.1 * jax.random.normal(kg, (n,), jnp.float32)
        beta = 0.1 * jax.random.normal(kb, (n,), jnp.float32)
        rmean = jnp.zeros((n,), jnp.float32)
        rvar = jnp.ones((n,), jnp.float32)
        return gamma, beta, rmean, rvar

    g1, be1, rm1, rv1 = bn(ks[8], ks[9], 128)
    g2, be2, rm2, rv2 = bn(ks[10], ks[11], 256)
    g3, be3, rm3, rv3 = bn(ks[12], ks[13], 128)

    return dict(w1=w1, b1=b1, w2=w2, b2=b2, w3=w3, b3=b3, w4=w4, b4=b4,
                g1=g1, be1=be1, rm1=rm1, rv1=rv1,
                g2=g2, be2=be2, rm2=rm2, rv2=rv2,
                g3=g3, be3=be3, rm3=rm3, rv3=rv3)


def reference_forward_f32(x, params):
    """Pure-JAX f32 reference of the original module (eval mode)."""
    def bn_fold(g, be, rm, rv):
        s = g / jnp.sqrt(rv + BN_EPS)
        return s, be - rm * s

    h = x @ params["w1"].T + params["b1"]
    s, t = bn_fold(params["g1"], params["be1"], params["rm1"], params["rv1"])
    h = _selu_full(h * s + t)
    h = h @ params["w2"].T + params["b2"]
    s, t = bn_fold(params["g2"], params["be2"], params["rm2"], params["rv2"])
    h = _selu_full(h * s + t)
    h = h @ params["w3"].T + params["b3"]
    s, t = bn_fold(params["g3"], params["be3"], params["rm3"], params["rv3"])
    h = _selu_full(h * s + t)
    return h @ params["w4"].T + params["b4"]


def reference_forward_prepared(x, prep):
    """Matched reference using the same folded bf16 weights as the kernel."""
    def dot(a, w):
        return jnp.dot(a.astype(jnp.bfloat16), w, preferred_element_type=jnp.float32)

    h = _selu_unscaled(dot(x, prep["w1"]) + prep["b1"])
    h = _selu_unscaled(dot(h, prep["w2"]) + prep["b2"])
    h = _selu_unscaled(dot(h, prep["w3"]) + prep["b3"])
    return dot(h, prep["w4"]) + prep["b4"]


def _check(x, params, prep, output_dim):
    out = jax.block_until_ready(mlp_forward(x, prep))
    assert out.shape == (x.shape[0], output_dim)

    # Tight check vs. a reference using the exact same folded/bf16 operands.
    ref_match = reference_forward_prepared(x, prep)
    assert jnp.allclose(out, ref_match, atol=1e-2, rtol=1e-2), \
        "mismatch vs matched (bf16-folded) reference"

    # Loose check vs. the full-f32 original-module reference (bf16 MXU operands
    # -> relaxed tolerance).
    ref_f32 = reference_forward_f32(x, params)
    assert jnp.allclose(out, ref_f32, atol=5e-2, rtol=5e-2), \
        "mismatch vs f32 reference"


if __name__ == "__main__":
    key = jax.random.PRNGKey(0)
    k_x, k_x2, k_p = jax.random.split(key, 3)

    input_dim = 32      # stand-in for X_train.shape[1]
    output_dim = 4      # stand-in for len(np.unique(y))

    params = init_params(k_p, input_dim, output_dim)

    # One-time offline parameter prep (BN/bias/SELU-scale folding, transpose, bf16).
    prep = prepare_params(params)
    prep = jax.tree_util.tree_map(jax.block_until_ready, prep)

    # Small batch: single grid step.
    x_small = jax.random.normal(k_x, (8, input_dim), jnp.float32)
    _check(x_small, params, prep, output_dim)

    # Batch that exercises the multi-tile + tail-padding path (grid of 2,
    # balanced tb=16, 8 padded rows sliced back off).
    x_med = jax.random.normal(k_x2, (24, input_dim), jnp.float32)
    _check(x_med, params, prep, output_dim)

    print("KERNEL_OK")
</pallas_src>

<mosaic_0001>
module attributes {stable_mosaic.version = 11 : i64} {
  func.func @mlp_kernel(%arg0: i32, %arg1: memref<8x32xf32, #tpu.memory_space<vmem>>, %arg2: memref<32x128xbf16, #tpu.memory_space<vmem>>, %arg3: memref<1x128xf32, #tpu.memory_space<vmem>>, %arg4: memref<128x256xbf16, #tpu.memory_space<vmem>>, %arg5: memref<1x256xf32, #tpu.memory_space<vmem>>, %arg6: memref<256x128xbf16, #tpu.memory_space<vmem>>, %arg7: memref<1x128xf32, #tpu.memory_space<vmem>>, %arg8: memref<128x4xbf16, #tpu.memory_space<vmem>>, %arg9: memref<1x4xf32, #tpu.memory_space<vmem>>, %arg10: memref<8x4xf32, #tpu.memory_space<vmem>>) attributes {dimension_semantics = [#tpu.dimension_semantics<parallel>], iteration_bounds = array<i64: 1>, scalar_prefetch = 0 : i64, scratch_operands = 0 : i64, tpu.core_type = #tpu.core_type<tc>, window_params = [{transform_indices = @transform_0, window_bounds = array<i64: 8, 32>}, {pipeline_mode = #tpu.pipeline_mode<synchronous>, transform_indices = @transform_1, window_bounds = array<i64: 32, 128>}, {pipeline_mode = #tpu.pipeline_mode<synchronous>, transform_indices = @transform_2, window_bounds = array<i64: 1, 128>}, {pipeline_mode = #tpu.pipeline_mode<synchronous>, transform_indices = @transform_3, window_bounds = array<i64: 128, 256>}, {pipeline_mode = #tpu.pipeline_mode<synchronous>, transform_indices = @transform_4, window_bounds = array<i64: 1, 256>}, {pipeline_mode = #tpu.pipeline_mode<synchronous>, transform_indices = @transform_5, window_bounds = array<i64: 256, 128>}, {pipeline_mode = #tpu.pipeline_mode<synchronous>, transform_indices = @transform_6, window_bounds = array<i64: 1, 128>}, {pipeline_mode = #tpu.pipeline_mode<synchronous>, transform_indices = @transform_7, window_bounds = array<i64: 128, 4>}, {pipeline_mode = #tpu.pipeline_mode<synchronous>, transform_indices = @transform_8, window_bounds = array<i64: 1, 4>}, {transform_indices = @transform_9, window_bounds = array<i64: 8, 4>}]} {
    %c0 = arith.constant 0 : index
    %c0_0 = arith.constant 0 : index
    %0 = vector.load %arg1[%c0, %c0_0] : memref<8x32xf32, #tpu.memory_space<vmem>>, vector<8x32xf32>
    %1 = arith.truncf %0 : vector<8x32xf32> to vector<8x32xbf16>
    %c0_1 = arith.constant 0 : index
    %c0_2 = arith.constant 0 : index
    %2 = vector.load %arg2[%c0_1, %c0_2] : memref<32x128xbf16, #tpu.memory_space<vmem>>, vector<32x128xbf16>
    %cst = arith.constant dense<0.000000e+00> : vector<8x128xf32>
    %3 = tpu.matmul %1, %2, %cst {dimension_numbers = #tpu.dot_dimension_numbers<[1], [0], [0], [1], [0, 0, 1, 1], [], []>} : vector<8x32xbf16>, vector<32x128xbf16>, vector<8x128xf32> -> vector<8x128xf32>
    %c0_3 = arith.constant 0 : index
    %c0_4 = arith.constant 0 : index
    %4 = vector.load %arg3[%c0_3, %c0_4] : memref<1x128xf32, #tpu.memory_space<vmem>>, vector<1x128xf32>
    %5 = vector.broadcast %4 : vector<1x128xf32> to vector<8x128xf32>
    %6 = arith.addf %3, %5 : vector<8x128xf32>
    %cst_5 = arith.constant 0.000000e+00 : f32
    %7 = vector.broadcast %cst_5 : f32 to vector<8x128xf32>
    %8 = arith.minimumf %6, %7 : vector<8x128xf32>
    %9 = math.exp %8 : vector<8x128xf32>
    %cst_6 = arith.constant 1.000000e+00 : f32
    %10 = vector.broadcast %cst_6 : f32 to vector<8x128xf32>
    %11 = arith.subf %9, %10 : vector<8x128xf32>
    %cst_7 = arith.constant 1.67326319 : f32
    %12 = vector.broadcast %cst_7 : f32 to vector<8x128xf32>
    %13 = arith.mulf %12, %11 : vector<8x128xf32>
    %cst_8 = arith.constant 0.000000e+00 : f32
    %14 = vector.broadcast %cst_8 : f32 to vector<8x128xf32>
    %15 = arith.cmpf ogt, %6, %14 : vector<8x128xf32>
    %16 = arith.select %15, %6, %13 : vector<8x128xi1>, vector<8x128xf32>
    %17 = arith.truncf %16 : vector<8x128xf32> to vector<8x128xbf16>
    %c0_9 = arith.constant 0 : index
    %c0_10 = arith.constant 0 : index
    %18 = vector.load %arg4[%c0_9, %c0_10] : memref<128x256xbf16, #tpu.memory_space<vmem>>, vector<128x256xbf16>
    %cst_11 = arith.constant dense<0.000000e+00> : vector<8x256xf32>
    %19 = tpu.matmul %17, %18, %cst_11 {dimension_numbers = #tpu.dot_dimension_numbers<[1], [0], [0], [1], [0, 0, 1, 1], [], []>} : vector<8x128xbf16>, vector<128x256xbf16>, vector<8x256xf32> -> vector<8x256xf32>
    %c0_12 = arith.constant 0 : index
    %c0_13 = arith.constant 0 : index
    %20 = vector.load %arg5[%c0_12, %c0_13] : memref<1x256xf32, #tpu.memory_space<vmem>>, vector<1x256xf32>
    %21 = vector.broadcast %20 : vector<1x256xf32> to vector<8x256xf32>
    %22 = arith.addf %19, %21 : vector<8x256xf32>
    %cst_14 = arith.constant 0.000000e+00 : f32
    %23 = vector.broadcast %cst_14 : f32 to vector<8x256xf32>
    %24 = arith.minimumf %22, %23 : vector<8x256xf32>
    %25 = math.exp %24 : vector<8x256xf32>
    %cst_15 = arith.constant 1.000000e+00 : f32
    %26 = vector.broadcast %cst_15 : f32 to vector<8x256xf32>
    %27 = arith.subf %25, %26 : vector<8x256xf32>
    %cst_16 = arith.constant 1.67326319 : f32
    %28 = vector.broadcast %cst_16 : f32 to vector<8x256xf32>
    %29 = arith.mulf %28, %27 : vector<8x256xf32>
    %cst_17 = arith.constant 0.000000e+00 : f32
    %30 = vector.broadcast %cst_17 : f32 to vector<8x256xf32>
    %31 = arith.cmpf ogt, %22, %30 : vector<8x256xf32>
    %32 = arith.select %31, %22, %29 : vector<8x256xi1>, vector<8x256xf32>
    %33 = arith.truncf %32 : vector<8x256xf32> to vector<8x256xbf16>
    %c0_18 = arith.constant 0 : index
    %c0_19 = arith.constant 0 : index
    %34 = vector.load %arg6[%c0_18, %c0_19] : memref<256x128xbf16, #tpu.memory_space<vmem>>, vector<256x128xbf16>
    %cst_20 = arith.constant dense<0.000000e+00> : vector<8x128xf32>
    %35 = tpu.matmul %33, %34, %cst_20 {dimension_numbers = #tpu.dot_dimension_numbers<[1], [0], [0], [1], [0, 0, 1, 1], [], []>} : vector<8x256xbf16>, vector<256x128xbf16>, vector<8x128xf32> -> vector<8x128xf32>
    %c0_21 = arith.constant 0 : index
    %c0_22 = arith.constant 0 : index
    %36 = vector.load %arg7[%c0_21, %c0_22] : memref<1x128xf32, #tpu.memory_space<vmem>>, vector<1x128xf32>
    %37 = vector.broadcast %36 : vector<1x128xf32> to vector<8x128xf32>
    %38 = arith.addf %35, %37 : vector<8x128xf32>
    %cst_23 = arith.constant 0.000000e+00 : f32
    %39 = vector.broadcast %cst_23 : f32 to vector<8x128xf32>
    %40 = arith.minimumf %38, %39 : vector<8x128xf32>
    %41 = math.exp %40 : vector<8x128xf32>
    %cst_24 = arith.constant 1.000000e+00 : f32
    %42 = vector.broadcast %cst_24 : f32 to vector<8x128xf32>
    %43 = arith.subf %41, %42 : vector<8x128xf32>
    %cst_25 = arith.constant 1.67326319 : f32
    %44 = vector.broadcast %cst_25 : f32 to vector<8x128xf32>
    %45 = arith.mulf %44, %43 : vector<8x128xf32>
    %cst_26 = arith.constant 0.000000e+00 : f32
    %46 = vector.broadcast %cst_26 : f32 to vector<8x128xf32>
    %47 = arith.cmpf ogt, %38, %46 : vector<8x128xf32>
    %48 = arith.select %47, %38, %45 : vector<8x128xi1>, vector<8x128xf32>
    %49 = arith.truncf %48 : vector<8x128xf32> to vector<8x128xbf16>
    %c0_27 = arith.constant 0 : index
    %c0_28 = arith.constant 0 : index
    %50 = vector.load %arg8[%c0_27, %c0_28] : memref<128x4xbf16, #tpu.memory_space<vmem>>, vector<128x4xbf16>
    %cst_29 = arith.constant dense<0.000000e+00> : vector<8x4xf32>
    %51 = tpu.matmul %49, %50, %cst_29 {dimension_numbers = #tpu.dot_dimension_numbers<[1], [0], [0], [1], [0, 0, 1, 1], [], []>} : vector<8x128xbf16>, vector<128x4xbf16>, vector<8x4xf32> -> vector<8x4xf32>
    %c0_30 = arith.constant 0 : index
    %c0_31 = arith.constant 0 : index
    %52 = vector.load %arg9[%c0_30, %c0_31] : memref<1x4xf32, #tpu.memory_space<vmem>>, vector<1x4xf32>
    %53 = vector.broadcast %52 : vector<1x4xf32> to vector<8x4xf32>
    %54 = arith.addf %51, %53 : vector<8x4xf32>
    %c0_32 = arith.constant 0 : index
    %c0_33 = arith.constant 0 : index
    %55 = vector.load %arg10[%c0_32, %c0_33] : memref<8x4xf32, #tpu.memory_space<vmem>>, vector<8x4xf32>
    tpu.vector_store %arg10[%c0_32, %c0_33], %54 {strides = array<i32>} : memref<8x4xf32, #tpu.memory_space<vmem>>, vector<8x4xf32>,
    return
  }
  func.func @transform_0(%arg0: i32) -> (i32, i32) {
    %c0_i32 = arith.constant 0 : i32
    %c0_i32_0 = arith.constant 0 : i32
    return %arg0, %c0_i32 : i32, i32
  }
  func.func @transform_1(%arg0: i32) -> (i32, i32) {
    %c0_i32 = arith.constant 0 : i32
    %c0_i32_0 = arith.constant 0 : i32
    %c0_i32_1 = arith.constant 0 : i32
    return %c0_i32, %c0_i32_0 : i32, i32
  }
  func.func @transform_2(%arg0: i32) -> (i32, i32) {
    %c0_i32 = arith.constant 0 : i32
    %c0_i32_0 = arith.constant 0 : i32
    %c0_i32_1 = arith.constant 0 : i32
    return %c0_i32, %c0_i32_0 : i32, i32
  }
  func.func @transform_3(%arg0: i32) -> (i32, i32) {
    %c0_i32 = arith.constant 0 : i32
    %c0_i32_0 = arith.constant 0 : i32
    %c0_i32_1 = arith.constant 0 : i32
    return %c0_i32, %c0_i32_0 : i32, i32
  }
  func.func @transform_4(%arg0: i32) -> (i32, i32) {
    %c0_i32 = arith.constant 0 : i32
    %c0_i32_0 = arith.constant 0 : i32
    %c0_i32_1 = arith.constant 0 : i32
    return %c0_i32, %c0_i32_0 : i32, i32
  }
  func.func @transform_5(%arg0: i32) -> (i32, i32) {
    %c0_i32 = arith.constant 0 : i32
    %c0_i32_0 = arith.constant 0 : i32
    %c0_i32_1 = arith.constant 0 : i32
    return %c0_i32, %c0_i32_0 : i32, i32
  }
  func.func @transform_6(%arg0: i32) -> (i32, i32) {
    %c0_i32 = arith.constant 0 : i32
    %c0_i32_0 = arith.constant 0 : i32
    %c0_i32_1 = arith.constant 0 : i32
    return %c0_i32, %c0_i32_0 : i32, i32
  }
  func.func @transform_7(%arg0: i32) -> (i32, i32) {
    %c0_i32 = arith.constant 0 : i32
    %c0_i32_0 = arith.constant 0 : i32
    %c0_i32_1 = arith.constant 0 : i32
    return %c0_i32, %c0_i32_0 : i32, i32
  }
  func.func @transform_8(%arg0: i32) -> (i32, i32) {
    %c0_i32 = arith.constant 0 : i32
    %c0_i32_0 = arith.constant 0 : i32
    %c0_i32_1 = arith.constant 0 : i32
    return %c0_i32, %c0_i32_0 : i32, i32
  }
  func.func @transform_9(%arg0: i32) -> (i32, i32) {
    %c0_i32 = arith.constant 0 : i32
    %c0_i32_0 = arith.constant 0 : i32
    return %arg0, %c0_i32 : i32, i32
  }
}

</mosaic_0001>

<bundles_post_ra>
// kernel: mlp_forward.1
= control target key start
LH: loop header
LB: loop body
LE: loop exit
PB: predicated region body
PF: predicated region fallthrough
CT: control target
= control target key end

     0   :  { %14 = vsyncpa [#allocation3], 0  ;;  %s905_s0 = inlined_call_operand.vmem [shape: f32[8,32], index: 0, kind: input, shape index: {}]   ;;  %s906_s1 = inlined_call_operand.vmem [shape: bf16[32,128], index: 1, kind: input, shape index: {}]   ;;  %s907_s2 = inlined_call_operand.vmem [shape: f32[1,128], index: 2, kind: input, shape index: {}]   ;;  %s908_s3 = inlined_call_operand.hbm [shape: bf16[128,256], index: 3, kind: input, shape index: {}]   ;;  %s909_s4 = inlined_call_operand.vmem [shape: f32[1,256], index: 4, kind: input, shape index: {}]   ;;  %s910_s5 = inlined_call_operand.hbm [shape: bf16[256,128], index: 5, kind: input, shape index: {}]   ;;  %s911_s6 = inlined_call_operand.vmem [shape: f32[1,128], index: 6, kind: input, shape index: {}]   ;;  %s912_s7 = inlined_call_operand.vmem [shape: bf16[128,4], index: 7, kind: input, shape index: {}]   ;;  %s913_s8 = inlined_call_operand.vmem [shape: f32[1,4], index: 8, kind: input, shape index: {}]   ;;  %s914_s9 = inlined_call_operand.vmem [shape: f32[8,4], index: 9, kind: output, shape index: {}]  }
   0x1   :  { %s26_s11 = sshll.u32 %s908_s3, 4  ;;  %s27_s11 = int_to_ptr.hbm [resolvable:$true] %s26_s11 }
   0x2   :  { %15 = vsyncpa [#allocation5], 0  ;;  %s795_s12 = smov [#allocation2]   ;;  %s41_s16 = sshll.u32 %s910_s5, 4  ;;  %s42_s16 = int_to_ptr.hbm [resolvable:$true] %s41_s16 }
   0x3   :  { %s28_s13 = sshll.u32 %s795_s12, 4  ;;  %s796_s17 = smov 128   ;;  %s29_s13 = int_to_ptr.vmem [resolvable:$true] %s28_s13 }
   0x4   :  { %s797_s18 = smov 8   ;;  %s798_s19 = smov [#allocation4]  }
   0x5   :  { %34 = dma.hbm_to_vmem [thread:$0]  %s27_s11, 2048, %s29_s13, [#allocation3], %s796_s17, %s796_s17, %s797_s18  }
   0x6   :  { %s43_s20 = sshll.u32 %s798_s19, 4  ;;  %s799_s21 = smov 64   ;;  %s44_s20 = int_to_ptr.vmem [resolvable:$true] %s43_s20 }
   0x7   :  { %s800_s22 = smov 4  }
   0x8   :  { %49 = dma.hbm_to_vmem [thread:$0]  %s42_s16, 2048, %s44_s20, [#allocation5], %s799_s21, %s799_s21, %s800_s22  }
   0x9   :  { %791 = dma.done.wait [#allocation3], 2048  }
   0xa   :  { %792 = vsyncadd [#allocation3], 4294965248 }
   0xb   :  { %793 = dma.done.wait [#allocation5], 2048  }
   0xc   :  { %794 = vsyncadd [#allocation5], 4294965248  ;;  %v685_v0 = vld [vmem:[%s906_s1 + $0x8] sm:$0xff]  ;;  %v684_v1 = vld [vmem:[%s906_s1] sm:$0xff]  ;;  %vm87_vm0 = vcmask 261120   ;;  %vm503_vm5 = vcmask 31744  }
   0xd   :  { %v65_v2 = vld [vmem:[%s905_s0] sm:$0xff]  ;;  %v579_v3 = vld [vmem:[#allocation2 + $0x70] sm:$0xf]  ;;  %v701_v4 = vld [vmem:[#allocation2 + $0x74] sm:$0xf0]  ;;  %97 = vmatpush.bf16.msra.mxu0 %v685_v0 }
   0xe   :  { %v700_v5 = vld [vmem:[#allocation2 + $0x74] sm:$0xf]  ;;  %v580_v6 = vor.u32 %v701_v4, %v579_v3  ;;  %v581_v7 = vld [vmem:[#allocation2 + $0x78] sm:$0xf0]  ;;  %v571_v8 = vld [vmem:[#allocation2 + $0x60] sm:$0xf]  ;;  %v66_v15 = vpack.c.bf16 %v65_v2, %v65_v2 }
   0xf   :  { %v699_v9 = vld [vmem:[#allocation2 + $0x64] sm:$0xf0]  ;;  %v584_v10 = vor.u32 %v700_v5, %v581_v7  ;;  %v698_v11 = vld [vmem:[#allocation2 + $0x64] sm:$0xf]  ;;  %v573_v12 = vld [vmem:[#allocation2 + $0x68] sm:$0xf0] }
  0x10   :  { %214 = vmatpush.bf16.msra.mxu1 %v580_v6  ;;  %v572_v13 = vor.u32 %v699_v9, %v571_v8  ;;  %v563_v14 = vld [vmem:[#allocation2 + $0x50] sm:$0xf]  ;;  %v576_v16 = vor.u32 %v698_v11, %v573_v12  ;;  %v697_v17 = vld [vmem:[#allocation2 + $0x54] sm:$0xf0]  ;;  %v696_v18 = vld [vmem:[#allocation2 + $0x54] sm:$0xf] }
  0x11   :  { %227 = vmatpush.bf16.msra.mxu2 %v584_v10  ;;  %98 = vmatpush.bf16.msra.mxu0 %v684_v1  ;;  %v565_v19 = vld [vmem:[#allocation2 + $0x58] sm:$0xf0]  ;;  %v564_v20 = vor.u32 %v697_v17, %v563_v14  ;;  %v555_v22 = vld [vmem:[#allocation2 + $0x40] sm:$0xf]  ;;  %v695_v23 = vld [vmem:[#allocation2 + $0x44] sm:$0xf0] }
  0x12   :  { %v568_v21 = vor.u32 %v696_v18, %v565_v19  ;;  %v694_v24 = vld [vmem:[#allocation2 + $0x44] sm:$0xf]  ;;  %v556_v25 = vor.u32 %v695_v23, %v555_v22  ;;  %v557_v26 = vld [vmem:[#allocation2 + $0x48] sm:$0xf0]  ;;  %v547_v28 = vld [vmem:[#allocation2 + $0x30] sm:$0xf] }
  0x13   :  { %v560_v27 = vor.u32 %v694_v24, %v557_v26  ;;  %v693_v29 = vld [vmem:[#allocation2 + $0x34] sm:$0xf0]  ;;  %v692_v30 = vld [vmem:[#allocation2 + $0x34] sm:$0xf]  ;;  %v549_v32 = vld [vmem:[#allocation2 + $0x38] sm:$0xf0] }
  0x14   :  { %215 = vmatpush.bf16.msra.mxu1 %v572_v13  ;;  %519 = vmatmul.msk.bf16.vlgmr.msra.gmra.mxu0 %vm87_vm0, %v66_v15  ;;  %v548_v31 = vor.u32 %v693_v29, %v547_v28  ;;  %v552_v33 = vor.u32 %v692_v30, %v549_v32  ;;  %v539_v34 = vld [vmem:[#allocation2 + $0x20] sm:$0xf]  ;;  %v691_v35 = vld [vmem:[#allocation2 + $0x24] sm:$0xf0]  ;;  %v690_v36 = vld [vmem:[#allocation2 + $0x24] sm:$0xf] }
  0x15   :  { %228 = vmatpush.bf16.msra.mxu2 %v576_v16  ;;  %v540_v37 = vor.u32 %v691_v35, %v539_v34  ;;  %v541_v38 = vld [vmem:[#allocation2 + $0x28] sm:$0xf0]  ;;  %v531_v39 = vld [vmem:[#allocation2 + $0x10] sm:$0xf]  ;;  %v689_v40 = vld [vmem:[#allocation2 + $0x14] sm:$0xf0] }
  0x16   :  { %v544_v41 = vor.u32 %v690_v36, %v541_v38  ;;  %v688_v42 = vld [vmem:[#allocation2 + $0x14] sm:$0xf]  ;;  %v533_v43 = vld [vmem:[#allocation2 + $0x18] sm:$0xf0]  ;;  %v532_v44 = vor.u32 %v689_v40, %v531_v39  ;;  %v523_v46 = vld [vmem:[#allocation2] sm:$0xf] }
  0x17   :  { %v536_v45 = vor.u32 %v688_v42, %v533_v43  ;;  %v687_v47 = vld [vmem:[#allocation2 + $0x4] sm:$0xf0]  ;;  %v686_v48 = vld [vmem:[#allocation2 + $0x4] sm:$0xf]  ;;  %v525_v49 = vld [vmem:[#allocation2 + $0x8] sm:$0xf0] }
  0x18   :  { %216 = vmatpush.bf16.msra.mxu1 %v564_v20  ;;  %v524_v50 = vor.u32 %v687_v47, %v523_v46  ;;  %v528_v51 = vor.u32 %v686_v48, %v525_v49  ;;  %v709_v52 = vld [vmem:[#allocation4 + $0x38] sm:$0xff]  ;;  %v708_v54 = vld [vmem:[#allocation4 + $0x30] sm:$0xff]  ;;  %v707_v55 = vld [vmem:[#allocation4 + $0x28] sm:$0xff] }
  0x19   :  { %229 = vmatpush.bf16.msra.mxu2 %v568_v21  ;;  %v717_v53 = vld [vmem:[#allocation4 + $0x78] sm:$0xff]  ;;  %388 = vmatpush.bf16.msra.mxu3 %v709_v52  ;;  %v732_v56 = vld [vmem:[%s907_s2] ss:$0 sm:$0xff]  ;;  %v716_v3 = vld [vmem:[#allocation4 + $0x70] sm:$0xff] }
  0x1a   :  { %401 = vmatpush.bf16.msrb.mxu0 %v717_v53  ;;  %v706_v4 = vld [vmem:[#allocation4 + $0x20] sm:$0xff]  ;;  %v715_v5 = vld [vmem:[#allocation4 + $0x68] sm:$0xff]  ;;  %v705_v6 = vld [vmem:[#allocation4 + $0x18] sm:$0xff] }
  0x1b   :  { %v714_v7 = vld [vmem:[#allocation4 + $0x60] sm:$0xff]  ;;  %v704_v8 = vld [vmem:[#allocation4 + $0x10] sm:$0xff]  ;;  %v713_v9 = vld [vmem:[#allocation4 + $0x58] sm:$0xff] }
  0x1c   :  { %217 = vmatpush.bf16.msra.mxu1 %v556_v25  ;;  %v703_v10 = vld [vmem:[#allocation4 + $0x8] sm:$0xff]  ;;  %v712_v11 = vld [vmem:[#allocation4 + $0x50] sm:$0xff]  ;;  %v702_v12 = vld [vmem:[#allocation4] sm:$0xff] }
  0x1d   :  { %230 = vmatpush.bf16.msra.mxu2 %v560_v27  ;;  %389 = vmatpush.bf16.msra.mxu3 %v708_v54  ;;  %v711_v13 = vld [vmem:[#allocation4 + $0x48] sm:$0xff]  ;;  %v710_v14 = vld [vmem:[#allocation4 + $0x40] sm:$0xff]  ;;  %v725_v16 = vld [vmem:[%s912_s7 + $0x38] sm:$0xff] }
  0x1e   :  { %402 = vmatpush.bf16.msrb.mxu0 %v716_v3  ;;  %v128_v15 = vld [vmem:[%s909_s4] sm:$0x3]  ;;  %v724_v18 = vld [vmem:[%s912_s7 + $0x30] sm:$0xff]  ;;  %v723_v40 = vld [vmem:[%s912_s7 + $0x28] sm:$0xff] }
  0x1f   :  { %v130_v17 = vperm.slane %v128_v15, 0  ;;  %v131_v22 = vperm.slane %v128_v15, 1  ;;  %v721_v42 = vld [vmem:[%s912_s7 + $0x18] sm:$0xff]  ;;  %v720_v43 = vld [vmem:[%s912_s7 + $0x10] sm:$0xff]  ;;  %v733_v46 = vld [vmem:[%s911_s6] ss:$0 sm:$0xff] }
  0x20   :  { %218 = vmatpush.bf16.msra.mxu1 %v548_v31 }
  0x21   :  { %231 = vmatpush.bf16.msra.mxu2 %v552_v33  ;;  %390 = vmatpush.bf16.msra.mxu3 %v707_v55 }
  0x22   :  { %403 = vmatpush.bf16.msrb.mxu0 %v715_v5 }
  0x24   :  { %219 = vmatpush.bf16.msra.mxu1 %v540_v37 }
  0x25   :  { %232 = vmatpush.bf16.msra.mxu2 %v544_v41  ;;  %391 = vmatpush.bf16.msra.mxu3 %v706_v4  ;;  %v722_v41 = vld [vmem:[%s912_s7 + $0x20] sm:$0xff] }
  0x26   :  { %404 = vmatpush.bf16.msrb.mxu0 %v714_v7 }
  0x28   :  { %220 = vmatpush.bf16.msra.mxu1 %v532_v44  ;;  %v719_v44 = vld [vmem:[%s912_s7 + $0x8] sm:$0xff] }
  0x29   :  { %233 = vmatpush.bf16.msra.mxu2 %v536_v45  ;;  %392 = vmatpush.bf16.msra.mxu3 %v705_v6  ;;  %v718_v45 = vld [vmem:[%s912_s7] sm:$0xff] }
  0x2a   :  { %405 = vmatpush.bf16.msrb.mxu0 %v713_v9 }
  0x2c   :  { %221 = vmatpush.bf16.msra.mxu1 %v524_v50 }
  0x2d   :  { %234 = vmatpush.bf16.msra.mxu2 %v528_v51  ;;  %393 = vmatpush.bf16.msra.mxu3 %v704_v8 }
  0x2e   :  { %406 = vmatpush.bf16.msrb.mxu0 %v712_v11 }
  0x30   :  { %490 = vmatpush.bf16.msrb.mxu1 %v725_v16 }
  0x31   :  { %394 = vmatpush.bf16.msra.mxu3 %v703_v10 }
  0x32   :  { %407 = vmatpush.bf16.msrb.mxu0 %v711_v13 }
  0x34   :  { %491 = vmatpush.bf16.msrb.mxu1 %v724_v18 }
  0x35   :  { %395 = vmatpush.bf16.msra.mxu3 %v702_v12 }
  0x36   :  { %408 = vmatpush.bf16.msrb.mxu0 %v710_v14 }
  0x38   :  { %492 = vmatpush.bf16.msrb.mxu1 %v723_v40 }
  0x3c   :  { %493 = vmatpush.bf16.msrb.mxu1 %v722_v41 }
  0x40   :  { %494 = vmatpush.bf16.msrb.mxu1 %v721_v42 }
  0x44   :  { %495 = vmatpush.bf16.msrb.mxu1 %v720_v43 }
  0x48   :  { %496 = vmatpush.bf16.msrb.mxu1 %v719_v44 }
  0x4c   :  { %497 = vmatpush.bf16.msrb.mxu1 %v718_v45 }
  0x91   :  { %v100_v57 = vpop.f32.mrf.mxu0 }
  0x92   :  { %v101_v58 = vadd.f32 %v732_v56, %v100_v57 }
  0x94   :  { %v104_v59 = vmin.f32 %v101_v58, 0.0  ;;  %vm109_vm1 = vcmp.gt.f32.partialorder %v101_v58, 0.0 }
  0x96   :  { %v105_v60 = vmul.f32 1.442695, %v104_v59 }
  0x98   :  { %735 = vpow2.f32 %v105_v60  ;;  %v734_v60 = vld [vmem:[%s913_s8] ss:$0 sm:$0xff] }
  0x99   :  { %v102_v61 = vpop.f32.mrf.mxu0 }
  0x9e   :  { %v736_v62 = vpop.eup %735 }
  0x9f   :  { %v520_v63 = vadd.f32 -1.0, %v736_v62 }
  0xa1   :  { %v108_v0 = vmul.f32 1.6732632, %v520_v63 }
  0xa3   :  { %v110_v1 = vsel %vm109_vm1, %v101_v58, %v108_v0 }
  0xa4   :  { %v111_v2 = vpack.c.bf16 %v110_v1, %v110_v1 }
  0xa6   :  { %222 = vmatmul.bf16.vlgmr.msra.gmra.mxu1 %v111_v2  ;;  %235 = vmatmul.bf16.vlgmr.msra.gmra.mxu2 %v111_v2 }
 0x123   :  { %v223_v19 = vpop.f32.mrf.mxu1 }
 0x124   :  { %v224_v20 = vadd.f32 %v223_v19, %v130_v17 }
 0x126   :  { %v240_v21 = vmin.f32 %v224_v20, 0.0  ;;  %vm250_vm2 = vcmp.gt.f32.partialorder %v224_v20, 0.0 }
 0x128   :  { %v242_v23 = vmul.f32 1.442695, %v240_v21 }
 0x129   :  { %v236_v24 = vpop.f32.mrf.mxu2 }
 0x12a   :  { %737 = vpow2.f32 %v242_v23  ;;  %v237_v25 = vadd.f32 %v236_v24, %v131_v22 }
 0x12b   :  { %v225_v26 = vpop.f32.mrf.mxu1 }
 0x12c   :  { %v241_v27 = vmin.f32 %v237_v25, 0.0  ;;  %vm251_vm3 = vcmp.gt.f32.partialorder %v237_v25, 0.0 }
 0x12e   :  { %v244_v28 = vmul.f32 1.442695, %v241_v27 }
 0x130   :  { %v738_v29 = vpop.eup %737  ;;  %739 = vpow2.f32 %v244_v28 }
 0x131   :  { %v238_v30 = vpop.f32.mrf.mxu2  ;;  %v585_v31 = vadd.f32 -1.0, %v738_v29 }
 0x133   :  { %v248_v32 = vmul.f32 1.6732632, %v585_v31 }
 0x135   :  { %v252_v33 = vsel %vm250_vm2, %v224_v20, %v248_v32 }
 0x136   :  { %v740_v34 = vpop.eup %739  ;;  %v254_v35 = vpack.c.bf16 %v252_v33, %v252_v33 }
 0x137   :  { %v586_v36 = vadd.f32 -1.0, %v740_v34 }
 0x138   :  { %396 = vmatmul.bf16.vlgmr.msra.gmra.mxu3 %v254_v35 }
 0x139   :  { %v249_v37 = vmul.f32 1.6732632, %v586_v36 }
 0x13b   :  { %v253_v38 = vsel %vm251_vm3, %v237_v25, %v249_v37 }
 0x13c   :  { %v255_v39 = vpack.c.bf16 %v253_v38, %v253_v38 }
 0x13e   :  { %409 = vmatmul.bf16.vlgmr.msrb.gmra.mxu0 %v255_v39 }
 0x1bb   :  { %v397_v47 = vpop.f32.mrf.mxu3  ;;  %v410_v48 = vpop.f32.mrf.mxu0 }
 0x1bc   :  { %v398_v49 = vadd.f32 %v733_v46, %v397_v47 }
 0x1be   :  { %v411_v50 = vadd.f32 %v410_v48, %v398_v49 }
 0x1c0   :  { %v414_v51 = vmin.f32 %v411_v50, 0.0  ;;  %vm419_vm4 = vcmp.gt.f32.partialorder %v411_v50, 0.0 }
 0x1c2   :  { %v415_v52 = vmul.f32 1.442695, %v414_v51 }
 0x1c3   :  { %v399_v53 = vpop.f32.mrf.mxu3  ;;  %v412_v54 = vpop.f32.mrf.mxu0 }
 0x1c4   :  { %741 = vpow2.f32 %v415_v52 }
 0x1ca   :  { %v742_v55 = vpop.eup %741 }
 0x1cb   :  { %v651_v56 = vadd.f32 -1.0, %v742_v55 }
 0x1cd   :  { %v418_v57 = vmul.f32 1.6732632, %v651_v56 }
 0x1cf   :  { %v420_v58 = vsel %vm419_vm4, %v411_v50, %v418_v57 }
 0x1d0   :  { %v421_v59 = vpack.c.bf16 %v420_v58, %v420_v58 }
 0x1d2   :  { %498 = vmatmul.bf16.vlgmr.msrb.gmra.mxu1 %v421_v59 }
 0x24f   :  { %v499_v61 = vpop.f32.mrf.mxu1 }
 0x250   :  { %v500_v62 = vadd.f32 %v734_v60, %v499_v61 }
 0x252   :  { %504 = vst.msk [vmem:[%s914_s9] sm:$0xff] %vm503_vm5, %v500_v62 }
 0x257   :  { %v501_v63 = vpop.f32.mrf.mxu1 }
 0x258   :  { %509 = vsyncpa [#allocation3], 1 }
 0x259   :  { %510 = vsyncpa [#allocation5], 1 }

</bundles_post_ra>
